<compile_context>
chip_gen: v7x
topology: tpu7x:2x2x1
jax: 0.10.0
libtpu: 0.0.40
codegen_flags: <defaults>
</compile_context>

<pallas_src>
import math
import jax
import jax.numpy as jnp
from jax.experimental import pallas as pl
from jax.experimental.pallas import tpu as pltpu


def _add_pe_kernel(x_ref, pe_ref, o_ref):
    # x_ref / o_ref: (B, T); pe_ref: (1, T). Broadcast-add over the batch dim.
    o_ref[...] = x_ref[...] + pe_ref[...]


def make_positional_encoding_table(dim, max_len=5000, dtype=jnp.float32):
    """Deterministically build the (max_len, dim) sin/cos PE table (plain JAX setup)."""
    if dim % 2 != 0:
        # Same latent requirement as the PyTorch original (cos write would mismatch).
        raise ValueError("PositionalEncoding requires an even `dim`.")
    position = jnp.arange(0, max_len, dtype=jnp.float32)[:, None]            # (max_len, 1)
    div_term = jnp.exp(
        jnp.arange(0, dim, 2, dtype=jnp.float32) * (-math.log(10000.0) / dim)
    )                                                                         # (dim//2,)
    angles = position * div_term                                              # (max_len, dim//2)
    pe = jnp.zeros((max_len, dim), dtype=jnp.float32)
    pe = pe.at[:, 0::2].set(jnp.sin(angles))
    pe = pe.at[:, 1::2].set(jnp.cos(angles))
    return pe.astype(dtype)                                                   # cast once at setup


def _divisors(n):
    out = []
    i = 1
    while i * i <= n:
        if n % i == 0:
            out.append(i)
            if i != n // i:
                out.append(n // i)
        i += 1
    return out


def _pick_tile(total, batch, itemsize,
               buffer_budget_bytes=24 * 1024 * 1024,
               target_block_bytes=4 * 1024 * 1024):
    """Pick T, the number of flattened (S*D) elements handled per grid step.

    Constraints:
      * T divides `total`           (no ragged edge, no masked stores),
      * T is a multiple of 128      (lane-dense) unless T == total (full-dim block),
      * double-buffered x/out/pe blocks fit the VMEM budget on all generations,
      * each x block is ~target_block_bytes to amortize per-step overhead.
    """
    per_elem_bytes = (4 * batch + 2) * itemsize      # 2x x-in + 2x out + 2x pe per T element
    cap = buffer_budget_bytes // per_elem_bytes
    cap = min(cap, max(128, target_block_bytes // max(1, batch * itemsize)))
    cap = max(cap, 128)
    if total <= cap:
        return total                                  # single step, full slab
    best = 0
    for d in _divisors(total):
        if d <= cap and d % 128 == 0 and d > best:
            best = d
    if best == 0:
        # Pathological shape (no lane-aligned divisor fits the budget): fall back to
        # one full-extent block — still correct, just not tiled.
        return total
    return best


def positional_encoding_forward(x, pe_table, *, force_pallas=True,
                                min_pallas_bytes=1 << 20):
    """x: (B, S, D); pe_table: (max_len, D). Returns x + pe_table[:S]."""
    B, S, D = x.shape
    max_len = pe_table.shape[0]
    if S > max_len:
        raise ValueError(f"seq_len {S} exceeds PE table max_len {max_len}")
    pe = pe_table[:S].astype(x.dtype)                 # (S, D) slice + one-time dtype cast

    itemsize = x.dtype.itemsize
    if (not force_pallas) and x.size * itemsize < min_pallas_bytes:
        # Tiny inputs: a fused XLA add has zero extra overhead; skip the kernel.
        return x + pe[None]

    total = S * D
    T = _pick_tile(total, B, itemsize)
    n_steps = total // T

    xf = x.reshape(B, total)                          # lane-dense flattened view
    pef = pe.reshape(1, total)

    out_flat = pl.pallas_call(
        _add_pe_kernel,
        out_shape=jax.ShapeDtypeStruct((B, total), x.dtype),
        grid_spec=pltpu.PrefetchScalarGridSpec(
            num_scalar_prefetch=0,
            grid=(n_steps,),
            in_specs=[
                pl.BlockSpec((B, T), lambda t: (0, t)),   # x: whole batch, T lanes per step
                pl.BlockSpec((1, T), lambda t: (0, t)),   # pe: read exactly once overall
            ],
            out_specs=pl.BlockSpec((B, T), lambda t: (0, t)),
        ),
        compiler_params=pltpu.CompilerParams(
            dimension_semantics=("parallel",),            # v7x: 2 TCs split the grid
            vmem_limit_bytes=32 * 1024 * 1024,            # raise v5e's 16 MiB scoped default
        ),
        input_output_aliases={0: 0},                      # in-place add: donate x's buffer
    )(xf, pef)

    return out_flat.reshape(B, S, D)


if __name__ == "__main__":
    # Small shapes consistent with the module's forward: (batch, seq, dim)
    B, S, D = 2, 8, 32
    MAX_LEN = 64

    key = jax.random.PRNGKey(0)
    x = jax.random.normal(key, (B, S, D), dtype=jnp.float32)

    pe_table = make_positional_encoding_table(D, max_len=MAX_LEN)

    out = positional_encoding_forward(x, pe_table, force_pallas=True)
    out = jax.block_until_ready(out)

    # Reference check (pure JAX).
    ref = x + pe_table[None, :S, :]
    assert out.shape == (B, S, D)
    assert jnp.allclose(out, ref, atol=1e-6), "mismatch vs reference"

    print("KERNEL_OK")
</pallas_src>

<mosaic_0001>
module attributes {stable_mosaic.version = 11 : i64} {
  func.func @_add_pe_kernel(%arg0: i32, %arg1: memref<2x256xf32, #tpu.memory_space<vmem>>, %arg2: memref<1x256xf32, #tpu.memory_space<vmem>>, %arg3: memref<2x256xf32, #tpu.memory_space<vmem>>) attributes {dimension_semantics = [#tpu.dimension_semantics<parallel>], iteration_bounds = array<i64: 1>, scalar_prefetch = 0 : i64, scratch_operands = 0 : i64, tpu.core_type = #tpu.core_type<tc>, window_params = [{transform_indices = @transform_0, window_bounds = array<i64: 2, 256>}, {transform_indices = @transform_1, window_bounds = array<i64: 1, 256>}, {transform_indices = @transform_2, window_bounds = array<i64: 2, 256>}]} {
    %c0 = arith.constant 0 : index
    %c0_0 = arith.constant 0 : index
    %0 = vector.load %arg1[%c0, %c0_0] : memref<2x256xf32, #tpu.memory_space<vmem>>, vector<2x256xf32>
    %c0_1 = arith.constant 0 : index
    %c0_2 = arith.constant 0 : index
    %1 = vector.load %arg2[%c0_1, %c0_2] : memref<1x256xf32, #tpu.memory_space<vmem>>, vector<1x256xf32>
    %2 = vector.broadcast %1 : vector<1x256xf32> to vector<2x256xf32>
    %3 = arith.addf %0, %2 : vector<2x256xf32>
    %c0_3 = arith.constant 0 : index
    %c0_4 = arith.constant 0 : index
    %4 = vector.load %arg3[%c0_3, %c0_4] : memref<2x256xf32, #tpu.memory_space<vmem>>, vector<2x256xf32>
    tpu.vector_store %arg3[%c0_3, %c0_4], %3 {strides = array<i32>} : memref<2x256xf32, #tpu.memory_space<vmem>>, vector<2x256xf32>,
    return
  }
  func.func @transform_0(%arg0: i32) -> (i32, i32) {
    %c0_i32 = arith.constant 0 : i32
    %c0_i32_0 = arith.constant 0 : i32
    return %c0_i32, %arg0 : i32, i32
  }
  func.func @transform_1(%arg0: i32) -> (i32, i32) {
    %c0_i32 = arith.constant 0 : i32
    %c0_i32_0 = arith.constant 0 : i32
    return %c0_i32, %arg0 : i32, i32
  }
  func.func @transform_2(%arg0: i32) -> (i32, i32) {
    %c0_i32 = arith.constant 0 : i32
    %c0_i32_0 = arith.constant 0 : i32
    return %c0_i32, %arg0 : i32, i32
  }
}

</mosaic_0001>

<bundles_post_ra>
// kernel: tpu_custom_call.1
= control target key start
LH: loop header
LB: loop body
LE: loop exit
PB: predicated region body
PF: predicated region fallthrough
CT: control target
= control target key end

     0   :  { %7 = vsyncpa [#allocation3], 0  ;;  %s157_s0 = inlined_call_operand.hbm [shape: f32[2,256], index: 0, kind: input, shape index: {}, may-alias: {0,2}]   ;;  %s158_s1 = inlined_call_operand.vmem [shape: f32[1,256], index: 1, kind: input, shape index: {}]   ;;  %s159_s2 = inlined_call_operand.hbm [shape: f32[2,256], index: 2, kind: output, shape index: {}, may-alias: {0,2}]  }
   0x1   :  { %8 = vsyncpa [#allocation4], 0  ;;  %s112_s9 = smov [#allocation2]   ;;  %s64_s13 = scalar_lea.hbm %s157_s0, 64 }
   0x2   :  { %s15_s10 = sshll.u32 %s112_s9, 4  ;;  %p65_p0 = scmp.ne.s32.totalorder %s157_s0, %s64_s13  ;;  %s16_s10 = int_to_ptr.vmem [resolvable:$true] %s15_s10 }
   0x3   :  { %p68_p1 = scmp.lt.u32.totalorder %s64_s13, %s157_s0 }
   0x5   :  { %p70_p2 = pnand %p68_p1, %p65_p0 }
   0x7   :  { %73 = shalt.err (!%p70_p2)
}
   0x8   :  { %s74_s18 = scalar_lea.vmem %s16_s10, 64  ;;  %p79_p4 = scmp.lt.s32.totalorder %s16_s10, %s16_s10 }
   0x9   :  { %p75_p3 = scmp.ne.s32.totalorder %s16_s10, %s74_s18  ;;  %p80_p5 = scmp.lt.s32.totalorder %s74_s18, %s74_s18 }
   0xb   :  { %p81_p6 = por %p80_p5, %p79_p4 }
   0xd   :  { %p82_p7 = pnand %p81_p6, %p75_p3 }
   0xf   :  { %85 = shalt.err (!%p82_p7)
}
  0x10   :  { %18 = dma.hbm_to_vmem [thread:$0]  %s157_s0, 64, %s16_s10, [#allocation3]  }
  0x11   :  { %108 = dma.done.wait [#allocation3], 64  }
  0x12   :  { %109 = vsyncadd [#allocation3], 4294967232  ;;  %v27_v0 = vlaneseq  ;;  %v113_v1 = vmov 1983009808   ;;  %v25_v7 = vld [vmem:[%s158_s1] sm:$0x3] }
  0x13   :  { %v37_v2 = vunpack.c.l.s4 %v113_v1  ;;  %v24_v12 = vld [vmem:[#allocation2] sm:$0xf]  ;;  %s114_s23 = smov [#allocation5]  }
  0x14   :  { %v28_v3 = vshrl.u32 %v27_v0, 7  ;;  %s52_s0 = sshll.u32 %s114_s23, 4  ;;  %s53_s0 = int_to_ptr.vmem [resolvable:$true] %s52_s0 }
  0x15   :  { %v38_v6 = vunpack.c.0.s8 %v37_v2  ;;  %s86_s24 = scalar_lea.vmem %s53_s0, 64  ;;  %p91_p9 = scmp.lt.s32.totalorder %s53_s0, %s53_s0 }
  0x16   :  { %v29_v4 = vsub.s32 0, %v28_v3  ;;  %v33_v5 = vsub.s32 1, %v28_v3  ;;  %p87_p8 = scmp.ne.s32.totalorder %s53_s0, %s86_s24  ;;  %p92_p10 = scmp.lt.s32.totalorder %s86_s24, %s86_s24 }
  0x17   :  { %v41_v10 = vsub.s32 %v38_v6, %v28_v3 }
  0x18   :  { %v30_v8 = vrot.slane %v25_v7, %v29_v4  ;;  %v34_v9 = vrot.slane %v25_v7, %v33_v5  ;;  %p93_p11 = por %p92_p10, %p91_p9 }
  0x1a   :  { %v35_v11 = vcombine.low %v30_v8, %v34_v9  ;;  %p94_p12 = pnand %p93_p11, %p87_p8 }
  0x1c   :  { %v42_v13 = vrot.slane %v35_v11, %v41_v10 }
  0x1e   :  { %v44_v14 = vadd.f32 %v42_v13, %v24_v12 }
  0x20   :  { %45 = vst [vmem:[#allocation5] sm:$0xf] %v44_v14 }
  0x21   :  { %97 = shalt.err (!%p94_p12)
}
  0x22   :  { %s98_s26 = scalar_lea.hbm %s159_s2, 64 }
  0x23   :  { %p99_p13 = scmp.ne.s32.totalorder %s159_s2, %s98_s26  ;;  %p102_p0 = scmp.lt.u32.totalorder %s98_s26, %s159_s2 }
  0x25   :  { %p104_p1 = pnand %p102_p0, %p99_p13 }
  0x27   :  { %107 = shalt.err (!%p104_p1)
}
  0x28   :  { %55 = dma.vmem_to_hbm [thread:$0]  %s53_s0, 64, %s159_s2, [#allocation4]  }
  0x29   :  { %110 = dma.done.wait [#allocation4], 64  }
  0x2a   :  { %111 = vsyncadd [#allocation4], 4294967232 }
  0x2b   :  { %59 = vsyncpa [#allocation3], 1 }
  0x2c   :  { %60 = vsyncpa [#allocation4], 1 }

</bundles_post_ra>
